<compile_context>
chip_gen: v7x
topology: tpu7x:2x2x1
jax: 0.10.0
libtpu: 0.0.40
codegen_flags: <defaults>
</compile_context>

<pallas_src>
import jax
import jax.numpy as jnp
from jax.experimental import pallas as pl
from jax.experimental.pallas import tpu as pltpu


_LANE = 128
_MAX_UNROLL = 64   # channels per block cap (bounds unrolled relayout code size)
_MIN_STEPS = 8     # target grid steps (>= 4 per TensorCore on 2-core chips)


def _round_up(v: int, m: int) -> int:
    return -(-v // m) * m


def _interp_matrix(out_size: int, in_size: int) -> jnp.ndarray:
    """Bilinear interpolation matrix (out_size, in_size), align_corners=False.

    Matches PyTorch's area_pixel_compute_source_index convention:
      src = (o + 0.5) * (in/out) - 0.5, clamped at 0; neighbors clamped at edge.
    """
    scale = in_size / out_size
    src = (jnp.arange(out_size, dtype=jnp.float32) + 0.5) * scale - 0.5
    src = jnp.maximum(src, 0.0)
    i0 = jnp.floor(src).astype(jnp.int32)
    i0 = jnp.minimum(i0, in_size - 1)
    i1 = jnp.minimum(i0 + 1, in_size - 1)
    w1 = src - i0.astype(jnp.float32)
    w0 = 1.0 - w1
    rows = jnp.arange(out_size)
    m = jnp.zeros((out_size, in_size), jnp.float32)
    m = m.at[rows, i0].add(w0)
    m = m.at[rows, i1].add(w1)
    return m


def _resize_kernel(x_ref, wy_ref, wxt_ref, o_ref, tmid_ref, rbuf_ref):
    # x_ref:    (TC, H_in, W_in)   input channel slices (input dtype)
    # wy_ref:   (H_out, H_in)      f32 row-interpolation matrix
    # wxt_ref:  (W_in, TW)         f32 column-interp matrix (pre-transposed)
    # o_ref:    (TC, H_out, TW)    output channel slices (input dtype)
    # tmid_ref: (H_in, TC*TW)      f32 scratch: pass-1 result in "wide" layout
    # rbuf_ref: (H_out, TC*TW)     f32 scratch: pass-2 result in "wide" layout
    tc, h_in, w_in = x_ref.shape
    tw = wxt_ref.shape[1]

    x = x_ref[...].astype(jnp.float32)

    # ---- Pass 1 (W direction): one matmul, M = TC*H_in ---------------------
    # The (TC, H_in) merge is free when H_in % 8 == 0; otherwise Mosaic
    # inserts a VMEM relayout copy (correct, just not free).
    t = jnp.dot(x.reshape(tc * h_in, w_in), wxt_ref[...],
                preferred_element_type=jnp.float32)           # (TC*H_in, TW)

    if tc == 1:
        # No channel relayout needed: straight 2-D matmul chain.
        r = jnp.dot(wy_ref[...], t, preferred_element_type=jnp.float32)
        o_ref[0, :, :] = r.astype(o_ref.dtype)
        return

    # ---- Relayout (TC, H_in, TW) -> (H_in, TC*TW) through VMEM scratch -----
    # Static ref-slice stores only; keeps pass 2 as ONE MXU-wide matmul and
    # avoids broadcasting Wy / issuing TC tiny matmuls.
    for c in range(tc):
        tmid_ref[:, c * tw:(c + 1) * tw] = t[c * h_in:(c + 1) * h_in, :]

    # ---- Pass 2 (H direction): one matmul, N = TC*TW -----------------------
    rbuf_ref[...] = jnp.dot(wy_ref[...], tmid_ref[...],
                            preferred_element_type=jnp.float32)  # (H_out, TC*TW)

    # ---- Scatter back to channel-major output block -------------------------
    for c in range(tc):
        o_ref[c, :, :] = rbuf_ref[:, c * tw:(c + 1) * tw].astype(o_ref.dtype)


def _per_channel_vmem(h_in, w_in, h_out, tw, itemsize, sub):
    """Approximate lane/sublane-padded VMEM footprint of one channel."""
    in_blk = _round_up(h_in, sub) * _round_up(w_in, _LANE) * itemsize
    out_blk = _round_up(h_out, sub) * _round_up(tw, _LANE) * itemsize
    x32 = _round_up(h_in, 8) * _round_up(w_in, _LANE) * 4     # f32 upcast of x
    t32 = _round_up(h_in, 8) * _round_up(tw, _LANE) * 4       # pass-1 result
    mid32 = _round_up(h_in, 8) * tw * 4                       # share of tmid scratch
    r32 = _round_up(h_out, 8) * tw * 4                        # share of rbuf scratch
    o32 = _round_up(h_out, 8) * _round_up(tw, _LANE) * 4      # pass-2 value
    # in/out blocks are double-buffered by the BlockSpec pipeline.
    return 2 * (in_blk + out_blk) + x32 + t32 + mid32 + r32 + o32


def resize_feature_map(x: jnp.ndarray, size, mode="bilinear", align_corners=False):
    """Pallas equivalent of ResizeFeatureMap.forward (bilinear, align_corners=False)."""
    assert mode == "bilinear" and not align_corners
    N, C, H_in, W_in = x.shape
    H_out, W_out = size
    NC = N * C
    dtype = x.dtype
    itemsize = jnp.dtype(dtype).itemsize
    sub = max(8, 32 // max(itemsize, 1))   # sublane granule: 8 f32 / 16 bf16 / 32 i8

    # Interpolation matrices, kept in f32 (tiny; keeps numerics torch-close
    # even for bf16 feature maps).
    wy = _interp_matrix(H_out, H_in)                    # (H_out, H_in)
    wxt = jnp.transpose(_interp_matrix(W_out, W_in))    # (W_in, W_out)

    # ---- generation-aware VMEM budget ---------------------------------------
    try:
        cap = int(pltpu.get_tpu_info().vmem_capacity_bytes)
    except Exception:
        cap = 64 * 1024 * 1024          # conservative fallback (v7x-sized VMEM)
    budget = int(cap * 0.30)
    vmem_limit = max(32 * 2**20, min(int(cap * 0.75), 96 * 2**20))

    reserve = 2 * (_round_up(H_out, 8) * _round_up(H_in, _LANE)
                   + _round_up(W_in, 8) * _round_up(W_out, _LANE)) * 4 + (2 << 20)

    # ---- spatial (W_out) tiling so even a single channel fits the budget ----
    tw = W_out
    while (_per_channel_vmem(H_in, W_in, H_out, tw, itemsize, sub) + reserve > budget
           and tw > _LANE):
        tw = _round_up(-(-tw // 2), _LANE)
    # TODO(synk): also tile H_out (and pick pass order by FLOP count) for truly
    # enormous / strongly-downsampled maps.
    n_wb = -(-W_out // tw)
    W_pad = n_wb * tw

    # ---- channels per block: fill VMEM but keep pipeline depth & unroll sane -
    per_chan = _per_channel_vmem(H_in, W_in, H_out, tw, itemsize, sub)
    tc_budget = max(1, (budget - reserve) // per_chan)
    min_steps = _MIN_STEPS if NC >= _MIN_STEPS else max(1, NC)
    tc_pipe = max(1, NC // min_steps)        # keeps >= min_steps grid steps
    tc = int(max(1, min(tc_budget, tc_pipe, _MAX_UNROLL, NC)))

    NC_pad = _round_up(NC, tc)
    x_flat = x.reshape(NC, H_in, W_in)
    if NC_pad != NC:
        x_flat = jnp.pad(x_flat, ((0, NC_pad - NC), (0, 0), (0, 0)))
    if W_pad != W_out:
        wxt = jnp.pad(wxt, ((0, 0), (0, W_pad - W_out)))

    grid = (NC_pad // tc, n_wb)

    cost = pl.CostEstimate(
        flops=2 * NC_pad * (H_in * W_in * W_pad + H_in * H_out * W_pad),
        transcendentals=0,
        bytes_accessed=(NC_pad * H_in * W_in * itemsize * n_wb
                        + NC_pad * H_out * W_pad * itemsize
                        + (H_out * H_in + W_in * W_pad) * 4),
    )

    out_flat = pl.pallas_call(
        _resize_kernel,
        out_shape=jax.ShapeDtypeStruct((NC_pad, H_out, W_pad), dtype),
        grid_spec=pltpu.PrefetchScalarGridSpec(
            num_scalar_prefetch=0,
            grid=grid,
            in_specs=[
                pl.BlockSpec((tc, H_in, W_in), lambda i, j: (i, 0, 0)),
                pl.BlockSpec((H_out, H_in), lambda i, j: (0, 0)),
                pl.BlockSpec((W_in, tw), lambda i, j: (0, j)),
            ],
            out_specs=pl.BlockSpec((tc, H_out, tw), lambda i, j: (i, 0, j)),
            scratch_shapes=[
                pltpu.VMEM((H_in, tc * tw), jnp.float32),
                pltpu.VMEM((H_out, tc * tw), jnp.float32),
            ],
        ),
        compiler_params=pltpu.CompilerParams(
            dimension_semantics=("parallel", "arbitrary"),
            vmem_limit_bytes=vmem_limit,
        ),
        cost_estimate=cost,
    )(x_flat, wy, wxt)

    if NC_pad != NC or W_pad != W_out:
        out_flat = out_flat[:NC, :, :W_out]
    return out_flat.reshape(N, C, H_out, W_out)


if __name__ == "__main__":
    key = jax.random.PRNGKey(0)

    # Small shapes consistent with the module: N=2, C=4, 16x16 -> 32x32.
    N, C, H, W = 2, 4, 16, 16
    size = (32, 32)
    x = jax.random.normal(key, (N, C, H, W), dtype=jnp.float32)

    out = resize_feature_map(x, size=size, mode="bilinear", align_corners=False)
    out = jax.block_until_ready(out)

    wy = _interp_matrix(size[0], H)
    wx = _interp_matrix(size[1], W)
    ref = jnp.einsum("oh,nchw,pw->ncop", wy, x, wx)
    assert out.shape == (N, C, size[0], size[1])
    assert jnp.allclose(out, ref, atol=1e-5, rtol=1e-5)

    # Second small case with more channels so the multi-channel-per-block
    # (wide single-matmul) path is exercised, with asymmetric output size.
    x2 = jax.random.normal(jax.random.PRNGKey(0), (2, 16, 16, 16), dtype=jnp.float32)
    size2 = (24, 40)
    out2 = jax.block_until_ready(resize_feature_map(x2, size=size2))
    ref2 = jnp.einsum("oh,nchw,pw->ncop",
                      _interp_matrix(size2[0], 16), x2, _interp_matrix(size2[1], 16))
    assert out2.shape == (2, 16, size2[0], size2[1])
    assert jnp.allclose(out2, ref2, atol=1e-5, rtol=1e-5)

    print("KERNEL_OK")
</pallas_src>

<mosaic_0001>
module attributes {stable_mosaic.version = 11 : i64} {
  func.func @_resize_kernel(%arg0: i32, %arg1: i32, %arg2: memref<1x16x16xf32, #tpu.memory_space<vmem>>, %arg3: memref<32x16xf32, #tpu.memory_space<vmem>>, %arg4: memref<16x32xf32, #tpu.memory_space<vmem>>, %arg5: memref<1x32x32xf32, #tpu.memory_space<vmem>>, %arg6: memref<16x32xf32, #tpu.memory_space<vmem>>, %arg7: memref<32x32xf32, #tpu.memory_space<vmem>>) attributes {dimension_semantics = [#tpu.dimension_semantics<parallel>, #tpu.dimension_semantics<arbitrary>], iteration_bounds = array<i64: 8, 1>, scalar_prefetch = 0 : i64, scratch_operands = 2 : i64, tpu.core_type = #tpu.core_type<tc>, window_params = [{transform_indices = @transform_0, window_bounds = array<i64: 1, 16, 16>}, {pipeline_mode = #tpu.pipeline_mode<synchronous>, transform_indices = @transform_1, window_bounds = array<i64: 32, 16>}, {transform_indices = @transform_2, window_bounds = array<i64: 16, 32>}, {transform_indices = @transform_3, window_bounds = array<i64: 1, 32, 32>}]} {
    %c0 = arith.constant 0 : index
    %c0_0 = arith.constant 0 : index
    %c0_1 = arith.constant 0 : index
    %0 = vector.load %arg2[%c0, %c0_0, %c0_1] : memref<1x16x16xf32, #tpu.memory_space<vmem>>, vector<1x16x16xf32>
    %1 = vector.shape_cast %0 : vector<1x16x16xf32> to vector<16x16xf32>
    %c0_2 = arith.constant 0 : index
    %c0_3 = arith.constant 0 : index
    %2 = vector.load %arg4[%c0_2, %c0_3] : memref<16x32xf32, #tpu.memory_space<vmem>>, vector<16x32xf32>
    %cst = arith.constant dense<0.000000e+00> : vector<16x32xf32>
    %3 = tpu.matmul %1, %2, %cst {dimension_numbers = #tpu.dot_dimension_numbers<[1], [0], [0], [1], [0, 0, 1, 1], [], []>} : vector<16x16xf32>, vector<16x32xf32>, vector<16x32xf32> -> vector<16x32xf32>
    %c0_4 = arith.constant 0 : index
    %c0_5 = arith.constant 0 : index
    %4 = vector.load %arg3[%c0_4, %c0_5] : memref<32x16xf32, #tpu.memory_space<vmem>>, vector<32x16xf32>
    %cst_6 = arith.constant dense<0.000000e+00> : vector<32x32xf32>
    %5 = tpu.matmul %4, %3, %cst_6 {dimension_numbers = #tpu.dot_dimension_numbers<[1], [0], [0], [1], [0, 0, 1, 1], [], []>} : vector<32x16xf32>, vector<16x32xf32>, vector<32x32xf32> -> vector<32x32xf32>
    %c0_7 = arith.constant 0 : index
    %c0_8 = arith.constant 0 : index
    %c0_9 = arith.constant 0 : index
    %6 = vector.load %arg5[%c0_7, %c0_8, %c0_9] : memref<1x32x32xf32, #tpu.memory_space<vmem>>, vector<1x32x32xf32>
    %7 = vector.shape_cast %6 : vector<1x32x32xf32> to vector<32x32xf32>
    %8 = vector.shape_cast %5 : vector<32x32xf32> to vector<1x32x32xf32>
    tpu.vector_store %arg5[%c0_7, %c0_8, %c0_9], %8 {strides = array<i32>} : memref<1x32x32xf32, #tpu.memory_space<vmem>>, vector<1x32x32xf32>,
    return
  }
  func.func @transform_0(%arg0: i32, %arg1: i32) -> (i32, i32, i32) {
    %c0_i32 = arith.constant 0 : i32
    %c0_i32_0 = arith.constant 0 : i32
    %c0_i32_1 = arith.constant 0 : i32
    return %arg0, %c0_i32, %c0_i32_0 : i32, i32, i32
  }
  func.func @transform_1(%arg0: i32, %arg1: i32) -> (i32, i32) {
    %c0_i32 = arith.constant 0 : i32
    %c0_i32_0 = arith.constant 0 : i32
    %c0_i32_1 = arith.constant 0 : i32
    return %c0_i32, %c0_i32_0 : i32, i32
  }
  func.func @transform_2(%arg0: i32, %arg1: i32) -> (i32, i32) {
    %c0_i32 = arith.constant 0 : i32
    %c0_i32_0 = arith.constant 0 : i32
    return %c0_i32, %arg1 : i32, i32
  }
  func.func @transform_3(%arg0: i32, %arg1: i32) -> (i32, i32, i32) {
    %c0_i32 = arith.constant 0 : i32
    %c0_i32_0 = arith.constant 0 : i32
    return %arg0, %c0_i32, %arg1 : i32, i32, i32
  }
}

</mosaic_0001>

<bundles_post_ra>
// kernel: tpu_custom_call.1
= control target key start
LH: loop header
LB: loop body
LE: loop exit
PB: predicated region body
PF: predicated region fallthrough
CT: control target
= control target key end

     0   :  { %8 = vsyncpa [#allocation5], 0  ;;  %s988_s0 = inlined_call_operand.hbm [shape: f32[8,16,16], index: 0, kind: input, shape index: {}]   ;;  %s989_s1 = inlined_call_operand.vmem [shape: f32[32,16], index: 1, kind: input, shape index: {}]   ;;  %s990_s2 = inlined_call_operand.vmem [shape: f32[16,32], index: 2, kind: input, shape index: {}]   ;;  %s991_s3 = inlined_call_operand.hbm [shape: f32[8,32,32], index: 3, kind: output, shape index: {}]  }
   0x1   :  { %10 = vsyncpa [#allocation5 + $0x1], 0 }
   0x2   :  { %11 = vsyncpa [#allocation6], 0 }
   0x3   :  { %13 = vsyncpa [#allocation6 + $0x1], 0  ;;  %s790_s12 = smov 0   ;;  %s792_s13 = smov 0  }
   0x4   :  { %s794_s14 = smov 0   ;;  %s796_s15 = smov 0  }
   0x5   :  { %s798_s16 = smov 0   ;;  %s800_s17 = smov 0  }
   0x6 LB: > { %s525_s18 = sadd.s32 4294967295, %s762_s17   ;;  %s526_s19 = sadd.s32 4294967294, %s762_s17   ;;  %s762_s17 = sphi %s800_s17, %s19_s17   ;;  %s758_s16 = sphi %s798_s16, %s1005_s16   ;;  %s754_s15 = sphi %s796_s15, %s1004_s15   ;;  %s750_s14 = sphi %s794_s14, %s1003_s14   ;;  %s746_s13 = sphi %s792_s13, %s1002_s13   ;;  %s742_s12 = sphi %s790_s12, %s1001_s12  }
   0x7   : > { %s31_s20 = sadd.s32 1, %s758_s16  ;;  %s38_s21 = sadd.s32 1, %s750_s14 }
   0x8   : > { %p33_p0 = scmp.ge.s32.totalorder %s31_s20, 8  ;;  %p45_p1 = scmp.ne.s32.totalorder %s750_s14, %s746_s13 }
   0x9   : > { %p46_p2 = scmp.eq.s32.totalorder %s762_s17, 0  ;;  %p51_p3 = scmp.ne.s32.totalorder %s746_s13, %s742_s12 }
   0xa   : > { %s1007_s20 = smov (%p33_p0, %s31_s20), 0  ;;  %p52_p5 = scmp.eq.s32.totalorder %s525_s18, 0 }
   0xb   : > { %p831_p4 = por %p46_p2, %p45_p1  ;;  %s35_s23 = ssub.s32 %s758_s16, %s1007_s20 }
   0xc   : > { %p124_p6 = scmp.eq.s32.totalorder %s525_s18, 7  ;;  %p36_p7 = scmp.eq.s32.totalorder %s35_s23, 0 }
   0xd   : > { %p837_p8 = por %p52_p5, %p51_p3  ;;  %p130_p10 = scmp.eq.s32.totalorder %s526_s19, 7 }
   0xe   : > { %p841_p9 = por %p124_p6, %p45_p1  ;;  %p596_p12 = scmp.lt.s32.totalorder %s762_s17, 8 }
   0xf   : > { %s846_s26 = scalar_select %p36_p7, %s750_s14, %s38_s21  }
  0x10   : > { %s995_s25 = scalar_select %p841_p9, 1, 0 }
  0x11   : > { %p848_p11 = por %p130_p10, %p51_p3  ;;  %s160_s28 = sand.u32 1, %s750_s14  }
  0x12   : > { %s530_s29 = sshll.u32 %s160_s28, 4  ;;  %s547_s30 = sshll.u32 %s758_s16, 8 }
  0x13   : > { %s996_s27 = scalar_select %p848_p11, 1, 0 }
  0x14   : > { %s858_s6 = scalar_lea.hbm %s988_s0, %s547_s30  ;;  %s164_s7 = scalar_lea.vmem [#allocation4], %s530_s29 }
  0x15   : > { %s171_s8 = sshll.u32 %s164_s7, 4  ;;  %p864_p13 = pnand %p596_p12, %p831_p4  ;;  %s860_s8 = int_to_ptr.vmem [resolvable:$true] %s171_s8 }
  0x16   : > { %s869_s10 = scalar_lea.sflag [#allocation5], %s160_s28  ;;  %s650_s11 = scalar_lea.hbm %s858_s6, 256 }
  0x17   : > { %p651_p1 = scmp.ne.s32.totalorder %s858_s6, %s650_s11  ;;  %p652_p2 = pneg %p864_p13 }
  0x18   : > { %s655_s21 = scalar_lea.hbm %s988_s0, 2048  ;;  %p656_p4 = scmp.lt.u32.totalorder %s858_s6, %s988_s0 }
  0x19   : > { %p653_p3 = pnand %p652_p2, %p651_p1  ;;  %p657_p6 = scmp.lt.u32.totalorder %s655_s21, %s650_s11 }
  0x1a   : > { %p659_p10 = scmp.lt.u32.totalorder %s650_s11, %s858_s6 }
  0x1b   : > { %p654_p5 = pneg %p653_p3  ;;  %p658_p7 = por %p657_p6, %p656_p4 }
  0x1d   : > { %p660_p12 = por %p659_p10, %p658_p7 }
  0x1f   : > { %p661_p0 = pnand %p660_p12, %p654_p5 }
  0x21   : > { %664 = shalt.err (!%p661_p0)
}
  0x22   : > { %s665_s28 = scalar_lea.vmem %s860_s8, 256  ;;  %s764_s29 = smov [#allocation4]  }
  0x23   : > { %p666_p1 = scmp.ne.s32.totalorder %s860_s8, %s665_s28  ;;  %s670_s30 = sshll.u32 %s764_s29, 4  ;;  %s671_s30 = int_to_ptr.vmem [resolvable:$false] %s670_s30 }
  0x24   : > { %s672_s4 = scalar_lea.vmem %s671_s30, 512  ;;  %p673_p9 = scmp.lt.s32.totalorder %s860_s8, %s671_s30 }
  0x25   : > { %p668_p3 = pnand %p666_p1, %p652_p2  ;;  %p674_p4 = scmp.lt.s32.totalorder %s672_s4, %s665_s28 }
  0x27   : > { %p669_p11 = pneg %p668_p3  ;;  %p675_p6 = por %p674_p4, %p673_p9 }
  0x29   : > { %p676_p7 = pnand %p675_p6, %p669_p11 }
  0x2b   : > { %679 = shalt.err (!%p676_p7)
}
  0x2c   : > { %s765_s5 = smov 128   ;;  %s766_s7 = smov 8  }
  0x2d   : > { %591 = dma.hbm_to_vmem [thread:$0]  (!%p864_p13), %s858_s6, 256, %s860_s8, %s869_s10, %s765_s5, %s765_s5, %s766_s7  }
  0x2e   : > { %p179_p0 = scmp.lt.s32.totalorder %s762_s17, 9  ;;  %p998_p2 = scmp.ge.s32.totalorder %s762_s17, 1 }
  0x30   : > { %p180_p5 = pnand %p998_p2, %p179_p0 }
  0x31   : > { %s901_s11 = sand.u32 (!%p180_p5), 1, %s746_s13  }
  0x32   : > { %183 = sbr.rel (%p180_p5) target bundleno = 516 (0x204), region = 32  ;;  %s534_s18 = sshll.u32 (!%p180_p5), %s901_s11, 4 }
  0x33   : > { %s186_s19 = scalar_lea.sflag (!%p180_p5), [#allocation5], %s901_s11  ;;  %s189_s21 = scalar_lea.vmem (!%p180_p5), [#allocation4], %s534_s18 }
  0x39   : > { %733 = dma.done.wait (%p837_p8), %s186_s19, 256  }
  0x3a   : > { %735 = vsyncadd (%p837_p8), %s186_s19, 4294967040  ;;  %vm224_vm0 = vcmask 130048   ;;  %v222_v0 = vld [vmem:[%s990_s2] sm:$0xff]  ;;  %v223_v1 = vld [vmem:[%s990_s2 + $0x8] sm:$0xff]  ;;  %s535_s7 = sshll.u32 %s901_s11, 5  ;;  %vm407_vm1 = vcmask 261120  }
  0x3b   : > { %v220_v2 = vld [vmem:[%s189_s21] sm:$0xff]  ;;  %v576_v3 = vpack.c.bf16 %v223_v1, %v222_v0  ;;  %v221_v4 = vld [vmem:[%s189_s21 + $0x8] sm:$0xff]  ;;  %s215_s18 = scalar_lea.vmem [#allocation7], %s535_s7  ;;  %s548_s21 = sshll.u32 %s754_s15, 9 }
  0x3c   : > { %563 = vmatprep.mubr.msk.f32.mxu0 %vm224_vm0, %v220_v2  ;;  %v306_v5 = vld [vmem:[%s989_s1] sm:$0xff]  ;;  %v307_v9 = vld [vmem:[%s989_s1 + $0x8] sm:$0xff]  ;;  %v308_v10 = vld [vmem:[%s989_s1 + $0x10] sm:$0xff]  ;;  %s427_s19 = sshll.u32 %s215_s18, 4  ;;  %s940_s9 = scalar_lea.hbm %s991_s3, %s548_s21  ;;  %s935_s19 = int_to_ptr.vmem [resolvable:$true] %s427_s19 }
  0x3d   : > { %577 = vmatprep.subr.bf16.mxu0 %v576_v3  ;;  %570 = vmatprep.mubr.msk.f32.mxu1 %vm224_vm0, %v306_v5  ;;  %v309_v11 = vld [vmem:[%s989_s1 + $0x18] sm:$0xff]  ;;  %s413_s10 = scalar_lea.sflag [#allocation6], %s901_s11  ;;  %s680_s24 = scalar_lea.vmem %s935_s19, 512 }
  0x3e   : > { %579 = vmatpush3.bf16.msra.mxu0 %v576_v3  ;;  %p681_p8 = scmp.ne.s32.totalorder %s935_s19, %s680_s24  ;;  %p999_p9 = scmp.ne.s32.totalorder %s995_s25, 0 }
  0x3f   : > { %s767_s15 = smov [#allocation7]  }
  0x40   : > { %p682_p11 = pnand %p681_p8, %p999_p9  ;;  %s684_s22 = sshll.u32 %s767_s15, 4  ;;  %s685_s22 = int_to_ptr.vmem [resolvable:$false] %s684_s22 }
  0x41   : > { %564 = vmatmul.mubr.msk.f32.vlgmr.msra.gmra.mrb[0].mxu0 %vm224_vm0, %v221_v4  ;;  %s686_s23 = scalar_lea.vmem %s685_s22, 1024  ;;  %p687_p10 = scmp.lt.s32.totalorder %s935_s19, %s685_s22 }
  0x42   : > { %p683_p13 = pneg %p682_p11  ;;  %p688_p12 = scmp.lt.s32.totalorder %s686_s23, %s680_s24 }
  0x44   : > { %p689_p1 = por %p688_p12, %p687_p10 }
  0x46   : > { %p690_p3 = pnand %p689_p1, %p683_p13 }
 0x114   : > { %v565_v6 = vpop.f32.mrb[0].mxu0 }
 0x115   : > { %v297_v7 = vpop.f32.mrb[1].mxu0 }
 0x116   : > { %v580_v8 = vpack.c.bf16 %v565_v6, %v297_v7 }
 0x118   : > { %581 = vmatprep.subr.bf16.mxu1 %v580_v8 }
 0x119   : > { %583 = vmatpush3.bf16.msra.mxu1 %v580_v8 }
 0x11c   : > { %571 = vmatmul.mubr.msk.f32.vlgmr.msra.gmra.mrb[0].mxu1 %vm224_vm0, %v307_v9 }
 0x11d   : > { %573 = vmatprep.mubr.msk.f32.mxu1 %vm224_vm0, %v308_v10 }
 0x120   : > { %574 = vmatmul.mubr.msk.f32.gmra.mrb[2].mxu1 %vm224_vm0, %v309_v11 }
 0x1ef   : > { %v572_v12 = vpop.f32.mrb[0].mxu1 }
 0x1f0   : > { %409 = vst.msk [vmem:[%s215_s18 + $0x8] sm:$0xff] %vm407_vm1, %v572_v12  ;;  %v388_v13 = vpop.f32.mrb[1].mxu1 }
 0x1f1   : > { %408 = vst.msk [vmem:[%s215_s18] sm:$0xff] %vm407_vm1, %v388_v13 }
 0x1f3   : > { %v575_v14 = vpop.f32.mrb[2].mxu1 }
 0x1f4   : > { %411 = vst.msk [vmem:[%s215_s18 + $0x18] sm:$0xff] %vm407_vm1, %v575_v14  ;;  %v398_v15 = vpop.f32.mrb[3].mxu1 }
 0x1f5   : > { %410 = vst.msk [vmem:[%s215_s18 + $0x10] sm:$0xff] %vm407_vm1, %v398_v15 }
 0x1f6   : > { %693 = shalt.err (!%p690_p3)
}
 0x1f7   : > { %s694_s28 = scalar_lea.hbm %s940_s9, 512  ;;  %s698_s4 = scalar_lea.hbm %s991_s3, 4096 }
 0x1f8   : > { %p695_p4 = scmp.ne.s32.totalorder %s940_s9, %s694_s28  ;;  %p699_p0 = scmp.lt.u32.totalorder %s940_s9, %s991_s3 }
 0x1f9   : > { %p700_p2 = scmp.lt.u32.totalorder %s698_s4, %s694_s28  ;;  %p702_p8 = scmp.lt.u32.totalorder %s694_s28, %s940_s9 }
 0x1fa   : > { %p696_p6 = pnand %p695_p4, %p999_p9 }
 0x1fb   : > { %p701_p5 = por %p700_p2, %p699_p0 }
 0x1fc   : > { %p697_p7 = pneg %p696_p6 }
 0x1fd   : > { %p703_p11 = por %p702_p8, %p701_p5 }
 0x1ff   : > { %p704_p13 = pnand %p703_p11, %p697_p7 }
 0x201   : > { %707 = shalt.err (!%p704_p13)
}
 0x202   : > { %s768_s18 = smov 128   ;;  %s769_s21 = smov 8  }
 0x203   : > { %586 = dma.vmem_to_hbm [thread:$0]  (%p999_p9), %s935_s19, 512, %s940_s9, %s413_s10, %s768_s18, %s768_s18, %s769_s21  }
 0x204 PF: > { %p597_p10 = scmp.ge.s32.totalorder %s762_s17, 2  ;;  %s442_s6 = sand.u32 1, %s742_s12  }
 0x205   : > { %p1000_p12 = scmp.ne.s32.totalorder %s996_s27, 0  ;;  %s443_s8 = scalar_lea.sflag [#allocation6], %s442_s6 }
 0x207   : > { %p593_p1 = pnand %p597_p10, %p1000_p12 }
 0x209   : > { %737 = dma.done.wait (!%p593_p1), %s443_s8, 512  }
 0x20a   : > { %739 = vsyncadd (!%p593_p1), %s443_s8, 4294966784  ;;  %s19_s17 = sadd.s32 1, %s762_s17   ;;  %s1001_s12 = smov %s746_s13 }
 0x20b   : > { %p16_p3 = scmp.ge.s32.totalorder %s19_s17, 10   ;;  %s1002_s13 = smov %s750_s14 }
 0x20c   : > { %s1003_s14 = smov %s846_s26  ;;  %s1004_s15 = smov %s758_s16 }
 0x20d   : > { %s1005_s16 = smov %s1007_s20  ;;  %18 = sbr.rel (!%p16_p3) target bundleno = 6 (0x6), region = 80 }
 0x214   :  { %448 = vsyncpa [#allocation5], 1 }
 0x215   :  { %450 = vsyncpa [#allocation5 + $0x1], 1 }
 0x216   :  { %451 = vsyncpa [#allocation6], 1 }
 0x217   :  { %453 = vsyncpa [#allocation6 + $0x1], 1 }

</bundles_post_ra>
